<compile_context>
chip_gen: v5e
topology: v5e:2x2
jax: 0.10.0
libtpu: 0.0.40
codegen_flags: <defaults>
</compile_context>

<pallas_src>
import functools

import jax
import jax.numpy as jnp
from jax.experimental import pallas as pl
from jax.experimental.pallas import tpu as pltpu

GAMMA, ZETA = -0.1, 1.1

# Tile caps. tc is kept a multiple of 32 so it is sublane-aligned for both
# f32 (8-row) and the int8 sign mask (32-row packing); tn a multiple of 128
# keeps loads/stores lane-dense (unmasked vst).
_TC_MAX = 512
_TN_MAX = 2048
# Below this many bytes of weight data, plain XLA beats pallas_call fixed cost.
_SMALL_BYTES = 1 << 20


def _round_up(v, m):
    return ((v + m - 1) // m) * m


def _adaround_kernel(x_ref, a_ref, p_ref, out_ref, *, soft_targets):
    # p_ref: (tc, 4) per-channel param slab [1/delta, delta, lo, hi]; its
    # index_map depends only on the C grid index, so it stays resident across
    # the inner N axis (one tiny DMA per C block).
    p = p_ref[...]
    inv_delta = p[:, 0:1]                               # (tc, 1)
    delta = p[:, 1:2]                                   # (tc, 1)
    lo = p[:, 2:3]                                      # (tc, 1)  = -floor(zp)
    hi = p[:, 3:4]                                      # (tc, 1)  = n_levels-1-floor(zp)

    x = x_ref[...]                                      # (tc, tn)
    x_floor = jnp.floor(x * inv_delta)                  # floor_ste forward

    if soft_targets:
        # sigmoid's exp/recip run on the EUP slot; the surrounding muls/adds
        # and clamps are VPU and hidden under DMA on v5e/v6e.
        h = jnp.clip(jax.nn.sigmoid(a_ref[...]) * (ZETA - GAMMA) + GAMMA,
                     0.0, 1.0)
        x_int = x_floor + h
    else:
        # a_ref is an int8 sign mask (1 where alpha >= 0, else 0): 1 B/elem of
        # read traffic instead of 4 B/elem of f32 alpha.
        x_int = x_floor + a_ref[...].astype(x.dtype)

    # clamp(x_int + zpf, 0, n-1) - zpf  ==  clamp(x_int, -zpf, n-1-zpf)
    out_ref[...] = jnp.clip(x_int, lo, hi) * delta


def adaround_forward(x, alpha, delta, zero_point, *, n_levels,
                     soft_targets=False, alpha_sign_mask=None, use_pallas=None):
    """AdaRound forward.

    x, alpha: (C, N) f32; delta, zero_point: (C, 1) f32 per out-channel.
    alpha_sign_mask: optional precomputed int8 (C, N) mask of (alpha >= 0);
        only used when soft_targets=False (callers in the AdaRound loop should
        cache it so alpha is not re-read every step).
    use_pallas: None = auto (XLA fallback for tiny tensors), True/False force.
    """
    C, N = x.shape

    if use_pallas is None:
        use_pallas = (C * N * x.dtype.itemsize) >= _SMALL_BYTES
    if not use_pallas:
        # Latency-bound tiny slabs: pallas_call fixed cost dominates; use XLA.
        return reference_forward(x, alpha, delta, zero_point,
                                 n_levels=n_levels, soft_targets=soft_targets)

    # Rounding-stream input: f32 alpha only when the soft targets are needed.
    if soft_targets:
        a_in = alpha
    else:
        if alpha_sign_mask is None:
            # TODO(synk): the AdaRound optimization loop should cache this
            # mask; recomputing here costs one extra small XLA pass over alpha.
            alpha_sign_mask = (alpha >= 0.0).astype(jnp.int8)
        a_in = alpha_sign_mask

    # Per-channel param slab (C, 4): [1/delta, delta, -floor(zp), n-1-floor(zp)].
    # Divide/floor hoisted here (C elements) instead of per (C*N) element.
    delta_c = delta.reshape(C, 1).astype(jnp.float32)
    zp_floor = jnp.floor(zero_point.reshape(C, 1).astype(jnp.float32))
    params = jnp.concatenate(
        [1.0 / delta_c, delta_c, -zp_floor, float(n_levels - 1) - zp_floor],
        axis=1)                                              # (C, 4)

    # Tile sizes (see _TC_MAX/_TN_MAX comment). Blocks need not divide (C, N):
    # Pallas handles the partial edge blocks; OOB input lanes hold garbage but
    # only feed output lanes that are never written back.
    tc = min(_TC_MAX, _round_up(C, 32))
    tn = min(_TN_MAX, _round_up(N, 128))
    gc, gn = pl.cdiv(C, tc), pl.cdiv(N, tn)
    if gc * gn == 1 and N >= 256:
        # Degenerate 1-step grid: split N so both v7x TensorCores get work.
        tn = _round_up(pl.cdiv(N, 2), 128)
        gn = pl.cdiv(N, tn)

    # Pad only the tiny param slab so no 1/0 etc. is ever formed in the tail
    # rows of a partial C block (cheap insurance; x/alpha stay unpadded).
    cp = gc * tc
    if cp != C:
        params = jnp.pad(params, ((0, cp - C), (0, 0)), constant_values=1.0)

    kernel = functools.partial(_adaround_kernel, soft_targets=soft_targets)

    return pl.pallas_call(
        kernel,
        out_shape=jax.ShapeDtypeStruct((C, N), x.dtype),
        # C outer, N inner: the (tc, 4) per-channel block is re-used across N.
        grid=(gc, gn),
        in_specs=[
            pl.BlockSpec((tc, tn), lambda i, j: (i, j)),   # x
            pl.BlockSpec((tc, tn), lambda i, j: (i, j)),   # alpha (f32) or mask (int8)
            pl.BlockSpec((tc, 4), lambda i, j: (i, 0)),    # per-channel params
        ],
        out_specs=pl.BlockSpec((tc, tn), lambda i, j: (i, j)),
        compiler_params=pltpu.CompilerParams(
            # Fully independent tiles -> megacore sharding on v7x, no-op on
            # single-TC v5e/v6e.
            dimension_semantics=("parallel", "parallel"),
            # Soft branch worst case: 3 f32 tiles x 2 buffers x 4 MiB = 24 MiB.
            vmem_limit_bytes=40 << 20,
        ),
    )(x, a_in, params)
    # TODO(synk): optionally emit a bf16 output when the consumer tolerates it
    # (another ~17% HBM-traffic cut); kept f32 to bit-match the reference.


def init_quant_params(w2d, n_bits):
    """Deterministic per-channel UniformAffineQuantizer-style init."""
    n_levels = 2 ** n_bits
    w_min = jnp.minimum(jnp.min(w2d, axis=1, keepdims=True), 0.0)
    w_max = jnp.maximum(jnp.max(w2d, axis=1, keepdims=True), 0.0)
    delta = (w_max - w_min) / float(n_levels - 1)
    delta = jnp.maximum(delta, 1e-8)
    zero_point = jnp.round(-w_min / delta)
    return delta, zero_point, n_levels


def init_alpha(w2d, delta):
    """AdaRound alpha init: -log((zeta-gamma)/(rest-gamma) - 1)."""
    x_floor = jnp.floor(w2d / delta)
    rest = w2d / delta - x_floor
    return -jnp.log((ZETA - GAMMA) / (rest - GAMMA) - 1.0)


def reference_forward(x, alpha, delta, zero_point, *, n_levels, soft_targets=False):
    """Pure-JAX reference mirroring the PyTorch module's forward (hoisted
    1/delta; otherwise the module's unfolded clamp form)."""
    inv_delta = 1.0 / delta
    x_floor = jnp.floor(x * inv_delta)
    if soft_targets:
        h = jnp.clip(jax.nn.sigmoid(alpha) * (ZETA - GAMMA) + GAMMA, 0.0, 1.0)
        x_int = x_floor + h
    else:
        x_int = x_floor + (alpha >= 0.0).astype(x.dtype)
    zp_floor = jnp.floor(zero_point)
    x_quant = jnp.clip(x_int + zp_floor, 0.0, float(n_levels - 1))
    return (x_quant - zp_floor) * delta


def _check(name, out, ref):
    assert out.shape == ref.shape, name
    assert jnp.allclose(out, ref, atol=1e-6, rtol=1e-5), name


if __name__ == "__main__":
    key = jax.random.PRNGKey(0)
    n_bits = 4

    # Case 1: small conv weight, PyTorch OIHW (out=8, in=4, kH=3, kW=3),
    # flattened to (8, 36). Exercises partial blocks on both axes.
    O, I, KH, KW = 8, 4, 3, 3
    w = jax.random.normal(key, (O, I, KH, KW), dtype=jnp.float32) * 0.5
    w2d = w.reshape(O, I * KH * KW)
    delta, zero_point, n_levels = init_quant_params(w2d, n_bits)
    alpha = init_alpha(w2d, delta)

    out_hard = jax.block_until_ready(
        adaround_forward(w2d, alpha, delta, zero_point, n_levels=n_levels,
                         soft_targets=False, use_pallas=True))
    _check("hard", out_hard,
           reference_forward(w2d, alpha, delta, zero_point,
                             n_levels=n_levels, soft_targets=False))

    out_soft = jax.block_until_ready(
        adaround_forward(w2d, alpha, delta, zero_point, n_levels=n_levels,
                         soft_targets=True, use_pallas=True))
    _check("soft", out_soft,
           reference_forward(w2d, alpha, delta, zero_point,
                             n_levels=n_levels, soft_targets=True))

    # Case 2: (6, 75) — C not /8, N not /128; single partial block each axis.
    key2 = jax.random.PRNGKey(1)
    w2 = jax.random.normal(key2, (6, 3, 5, 5), dtype=jnp.float32).reshape(6, 75)
    d2, zp2, nl2 = init_quant_params(w2, n_bits)
    a2 = init_alpha(w2, d2)
    o2 = jax.block_until_ready(
        adaround_forward(w2, a2, d2, zp2, n_levels=nl2, soft_targets=True,
                         use_pallas=True))
    _check("padded-soft", o2, reference_forward(w2, a2, d2, zp2,
                                                n_levels=nl2, soft_targets=True))

    # Case 3: (40, 512) conv weight (out=40, in=8, k=8x8) — triggers the
    # degenerate-grid N split (two N steps) plus a partial C block.
    key3 = jax.random.PRNGKey(2)
    w3 = jax.random.normal(key3, (40, 8, 8, 8), dtype=jnp.float32).reshape(40, 512)
    d3, zp3, nl3 = init_quant_params(w3, n_bits)
    a3 = init_alpha(w3, d3)
    o3h = jax.block_until_ready(
        adaround_forward(w3, a3, d3, zp3, n_levels=nl3, soft_targets=False,
                         use_pallas=True))
    _check("split-hard", o3h, reference_forward(w3, a3, d3, zp3,
                                                n_levels=nl3, soft_targets=False))
    o3s = jax.block_until_ready(
        adaround_forward(w3, a3, d3, zp3, n_levels=nl3, soft_targets=True,
                         use_pallas=True))
    _check("split-soft", o3s, reference_forward(w3, a3, d3, zp3,
                                                n_levels=nl3, soft_targets=True))

    # Case 4: auto dispatch — tiny tensor goes through the XLA escape hatch.
    o4 = jax.block_until_ready(
        adaround_forward(w2d, alpha, delta, zero_point, n_levels=n_levels,
                         soft_targets=False))
    _check("escape-hatch", o4, out_hard)

    # TODO(synk): 'stochastic' round_mode (torch.bernoulli) not wired; it would
    # use pltpu.prng_seed / pltpu.prng_random_bits. 'nearest'/'nearest_ste'
    # modes are also not implemented (only 'learned_hard_sigmoid').
    print("KERNEL_OK")
</pallas_src>

<mosaic_0001>
module attributes {stable_mosaic.version = 11 : i64} {
  func.func @_adaround_kernel(%arg0: i32, %arg1: i32, %arg2: memref<32x128xf32, #tpu.memory_space<vmem>>, %arg3: memref<32x128xi8, #tpu.memory_space<vmem>>, %arg4: memref<32x4xf32, #tpu.memory_space<vmem>>, %arg5: memref<32x128xf32, #tpu.memory_space<vmem>>) attributes {dimension_semantics = [#tpu.dimension_semantics<parallel>, #tpu.dimension_semantics<parallel>], iteration_bounds = array<i64: 1, 1>, scalar_prefetch = 0 : i64, scratch_operands = 0 : i64, tpu.core_type = #tpu.core_type<tc>, window_params = [{transform_indices = @transform_0, window_bounds = array<i64: 32, 128>}, {transform_indices = @transform_1, window_bounds = array<i64: 32, 128>}, {transform_indices = @transform_2, window_bounds = array<i64: 32, 4>}, {transform_indices = @transform_3, window_bounds = array<i64: 32, 128>}]} {
    %c0 = arith.constant 0 : index
    %c0_0 = arith.constant 0 : index
    %0 = vector.load %arg4[%c0, %c0_0] : memref<32x4xf32, #tpu.memory_space<vmem>>, vector<32x4xf32>
    %1 = vector.extract_strided_slice %0 {offsets = [0, 0], sizes = [32, 1], strides = [1, 1]} : vector<32x4xf32> to vector<32x1xf32>
    %2 = vector.extract_strided_slice %0 {offsets = [0, 1], sizes = [32, 1], strides = [1, 1]} : vector<32x4xf32> to vector<32x1xf32>
    %3 = vector.extract_strided_slice %0 {offsets = [0, 2], sizes = [32, 1], strides = [1, 1]} : vector<32x4xf32> to vector<32x1xf32>
    %4 = vector.extract_strided_slice %0 {offsets = [0, 3], sizes = [32, 1], strides = [1, 1]} : vector<32x4xf32> to vector<32x1xf32>
    %c0_1 = arith.constant 0 : index
    %c0_2 = arith.constant 0 : index
    %5 = vector.load %arg2[%c0_1, %c0_2] : memref<32x128xf32, #tpu.memory_space<vmem>>, vector<32x128xf32>
    %6 = vector.broadcast %1 : vector<32x1xf32> to vector<32x128xf32>
    %7 = arith.mulf %5, %6 : vector<32x128xf32>
    %8 = math.floor %7 : vector<32x128xf32>
    %c0_3 = arith.constant 0 : index
    %c0_4 = arith.constant 0 : index
    %9 = vector.load %arg3[%c0_3, %c0_4] : memref<32x128xi8, #tpu.memory_space<vmem>>, vector<32x128xi8>
    %10 = arith.sitofp %9 : vector<32x128xi8> to vector<32x128xf32>
    %11 = arith.addf %8, %10 : vector<32x128xf32>
    %12 = vector.broadcast %3 : vector<32x1xf32> to vector<32x128xf32>
    %13 = arith.maximumf %12, %11 : vector<32x128xf32>
    %14 = vector.broadcast %4 : vector<32x1xf32> to vector<32x128xf32>
    %15 = arith.minimumf %14, %13 : vector<32x128xf32>
    %16 = vector.broadcast %2 : vector<32x1xf32> to vector<32x128xf32>
    %17 = arith.mulf %15, %16 : vector<32x128xf32>
    %c0_5 = arith.constant 0 : index
    %c0_6 = arith.constant 0 : index
    %18 = vector.load %arg5[%c0_5, %c0_6] : memref<32x128xf32, #tpu.memory_space<vmem>>, vector<32x128xf32>
    tpu.vector_store %arg5[%c0_5, %c0_6], %17 {strides = array<i32>} : memref<32x128xf32, #tpu.memory_space<vmem>>, vector<32x128xf32>,
    return
  }
  func.func @transform_0(%arg0: i32, %arg1: i32) -> (i32, i32) {
    %c0_i32 = arith.constant 0 : i32
    return %arg0, %arg1 : i32, i32
  }
  func.func @transform_1(%arg0: i32, %arg1: i32) -> (i32, i32) {
    %c0_i32 = arith.constant 0 : i32
    return %arg0, %arg1 : i32, i32
  }
  func.func @transform_2(%arg0: i32, %arg1: i32) -> (i32, i32) {
    %c0_i32 = arith.constant 0 : i32
    %c0_i32_0 = arith.constant 0 : i32
    return %arg0, %c0_i32 : i32, i32
  }
  func.func @transform_3(%arg0: i32, %arg1: i32) -> (i32, i32) {
    %c0_i32 = arith.constant 0 : i32
    return %arg0, %arg1 : i32, i32
  }
}

</mosaic_0001>

<bundles_post_ra>
// kernel: tpu_custom_call.1
= control target key start
LH: loop header
LB: loop body
LE: loop exit
PB: predicated region body
PF: predicated region fallthrough
CT: control target
= control target key end

     0   :  { %v202_v2 = vmov 0   ;;  %s259_s0 = inlined_call_operand.vmem [shape: f32[8,36], index: 0, kind: input, shape index: {}]   ;;  %s260_s1 = inlined_call_operand.vmem [shape: s8[8,36], index: 1, kind: input, shape index: {}]   ;;  %s261_s2 = inlined_call_operand.vmem [shape: f32[32,4], index: 2, kind: input, shape index: {}]   ;;  %s262_s3 = inlined_call_operand.hbm [shape: f32[8,36], index: 3, kind: output, shape index: {}]  }
   0x1   :  { %v17_v0 = vld [vmem:[%s261_s2 + $0x10] sm:$0xff]  ;;  %v15_v1 = vld [vmem:[%s261_s2] sm:$0xff]  ;;  %166 = vset.pattern.permute.xlu1 %v202_v2  ;;  %165 = vset.pattern.permute.xlu0 %v202_v2 }
   0x2   :  { %8 = vsyncpa [#allocation3], 0  ;;  %35 = vperm.xlu1 %166, %v17_v0   ;;  %25 = vperm.xlu0 %165, %v15_v1   ;;  %v203_v3 = vmov 2   ;;  %v18_v4 = vld [vmem:[%s261_s2 + $0x18] sm:$0xff]  ;;  %v16_v5 = vld [vmem:[%s261_s2 + $0x8] sm:$0xff]  ;;  %v204_v6 = vmov 3  }
   0x3   :  { %167 = vset.pattern.permute.xlu2 %v203_v3  ;;  %v205_v7 = vmov 1   ;;  %v20_v16 = vld [vmem:[%s259_s0 + $0x8] sm:$0xff]  ;;  %v150_v17 = vld [vmem:[%s260_s1] sm:$0xff]   ;;  %v22_v18 = vld [vmem:[%s259_s0 + $0x18] sm:$0xff] }
   0x4   :  { %68 = vperm.xlu2 %167, %v15_v1   ;;  %v152_v19 = vunpack.c.1.s8 %v150_v17  ;;  %v19_v21 = vld [vmem:[%s259_s0] sm:$0xff]  ;;  %v156_v23 = vunpack.c.3.s8 %v150_v17  ;;  %v151_v29 = vunpack.c.0.s8 %v150_v17  ;;  %v21_v37 = vld [vmem:[%s259_s0 + $0x10] sm:$0xff]  ;;  %v155_v47 = vunpack.c.2.s8 %v150_v17 }
   0x6   :  { %v60_v25 = vcvt.s32.f32 %v152_v19  ;;  %v62_v32 = vcvt.s32.f32 %v156_v23  ;;  %v59_v34 = vcvt.s32.f32 %v151_v29  ;;  %v61_v52 = vcvt.s32.f32 %v155_v47 }
   0xa   :  { %40 = vperm.xlu1 %166, %v18_v4   ;;  %30 = vperm.xlu0 %165, %v16_v5  }
   0xc   :  { %72 = vperm.xlu2 %167, %v16_v5  }
  0x12   :  { %169 = vset.pattern.permute.xlu1 %v203_v3  ;;  %168 = vset.pattern.permute.xlu0 %v203_v3 }
  0x13   :  { %80 = vperm.xlu1 %169, %v18_v4   ;;  %76 = vperm.xlu0 %168, %v17_v0  }
  0x14   :  { %170 = vset.pattern.permute.xlu2 %v204_v6 }
  0x15   :  { %88 = vperm.xlu2 %170, %v15_v1  }
  0x1b   :  { %171 = vset.pattern.permute.xlu1 %v204_v6  ;;  %172 = vset.pattern.permute.xlu0 %v204_v6 }
  0x1c   :  { %92 = vperm.xlu1 %171, %v16_v5   ;;  %100 = vperm.xlu0 %172, %v18_v4  }
  0x1d   :  { %96 = vperm.xlu2 %170, %v17_v0  }
  0x24   :  { %173 = vset.pattern.permute.xlu1 %v205_v7  ;;  %175 = vset.pattern.permute.xlu0 %v205_v7 }
  0x25   :  { %108 = vperm.xlu1 %173, %v15_v1   ;;  %174 = vset.pattern.permute.xlu2 %v205_v7 }
  0x26   :  { %112 = vperm.xlu2 %174, %v16_v5  }
  0x2d   :  { %116 = vperm.xlu1 %173, %v17_v0  }
  0x2e   :  { %120 = vperm.xlu2 %174, %v18_v4  }
  0x5e   :  { %v69_v8 = vpop.permute.xlu2 %68 }
  0x66   :  { %v73_v9 = vpop.permute.xlu2 %72 }
  0x6f   :  { %v89_v10 = vpop.permute.xlu2 %88 }
  0x74   :  { %v36_v11 = vpop.permute.xlu1 %35  ;;  %v26_v12 = vpop.permute.xlu0 %25 }
  0x75   :  { %v43_v30 = vmul.f32 %v26_v12, %v19_v21  ;;  %v45_v46 = vmul.f32 %v36_v11, %v21_v37 }
  0x77   :  { %v97_v13 = vpop.permute.xlu2 %96  ;;  %v47_v35 = vfloor.f32 %v43_v30  ;;  %v49_v51 = vfloor.f32 %v45_v46 }
  0x79   :  { %v63_v41 = vadd.f32 %v59_v34, %v47_v35  ;;  %v65_v55 = vadd.f32 %v61_v52, %v49_v51 }
  0x7b   :  { %v83_v50 = vmax.f32 %v69_v8, %v63_v41 }
  0x7c   :  { %v41_v14 = vpop.permute.xlu1 %40  ;;  %v31_v15 = vpop.permute.xlu0 %30 }
  0x7d   :  { %v44_v20 = vmul.f32 %v31_v15, %v20_v16  ;;  %v46_v22 = vmul.f32 %v41_v14, %v22_v18  ;;  %v103_v53 = vmin.f32 %v89_v10, %v83_v50 }
  0x7f   :  { %v48_v26 = vfloor.f32 %v44_v20  ;;  %v50_v31 = vfloor.f32 %v46_v22 }
  0x80   :  { %v113_v24 = vpop.permute.xlu2 %112 }
  0x81   :  { %v64_v33 = vadd.f32 %v60_v25, %v48_v26  ;;  %v66_v36 = vadd.f32 %v62_v32, %v50_v31 }
  0x83   :  { %v84_v39 = vmax.f32 %v73_v9, %v64_v33 }
  0x85   :  { %v81_v27 = vpop.permute.xlu1 %80  ;;  %v77_v28 = vpop.permute.xlu0 %76 }
  0x86   :  { %v86_v38 = vmax.f32 %v81_v27, %v66_v36  ;;  %v85_v57 = vmax.f32 %v77_v28, %v65_v55 }
  0x88   :  { %v121_v40 = vpop.permute.xlu2 %120  ;;  %v105_v58 = vmin.f32 %v97_v13, %v85_v57 }
  0x8e   :  { %v93_v42 = vpop.permute.xlu1 %92  ;;  %v101_v43 = vpop.permute.xlu0 %100 }
  0x8f   :  { %v104_v44 = vmin.f32 %v93_v42, %v84_v39  ;;  %v106_v45 = vmin.f32 %v101_v43, %v86_v38 }
  0x91   :  { %v124_v48 = vmul.f32 %v113_v24, %v104_v44  ;;  %v126_v49 = vmul.f32 %v121_v40, %v106_v45 }
  0x93   :  { %128 = vst [vmem:[#allocation2 + $0x8] sm:$0xff] %v124_v48 }
  0x94   :  { %130 = vst [vmem:[#allocation2 + $0x18] sm:$0xff] %v126_v49 }
  0x97   :  { %v109_v54 = vpop.permute.xlu1 %108 }
  0x98   :  { %v123_v56 = vmul.f32 %v109_v54, %v103_v53 }
  0x9a   :  { %127 = vst [vmem:[#allocation2] sm:$0xff] %v123_v56 }
  0x9f   :  { %v117_v59 = vpop.permute.xlu1 %116 }
  0xa0   :  { %v125_v60 = vmul.f32 %v117_v59, %v105_v58 }
  0xa2   :  { %129 = vst [vmem:[#allocation2 + $0x10] sm:$0xff] %v125_v60 }
  0xa3   :  { %134 = vsyncadd [#allocation3], 384  ;;  %s137_s29 = sshll.u32 %s262_s3, 4  ;;  %s206_s30 = smov [#allocation2]   ;;  %s138_s29 = int_to_ptr.hbm [resolvable:$true] %s137_s29 }
  0xa4   :  { %s135_s4 = sshll.u32 %s206_s30, 4  ;;  %s207_s5 = smov 128   ;;  %s136_s4 = int_to_ptr.vmem [resolvable:$true] %s135_s4 }
  0xa5   :  { %s208_s6 = smov 8  }
  0xa6   :  { %143 = dma.vmem_to_hbm [thread:$0]  %s136_s4, 128, %s138_s29, [#allocation3], %s207_s5, %s207_s5, %s208_s6  }
  0xa7   :  { %200 = dma.done.wait [#allocation3], 512  }
  0xa8   :  { %201 = vsyncadd [#allocation3], 4294966784 }
  0xa9   :  { %148 = vsyncpa [#allocation3], 1 }

</bundles_post_ra>
